<compile_context>
chip_gen: v7x
topology: tpu7x:2x2x1
jax: 0.10.0
libtpu: 0.0.40
codegen_flags: <defaults>
</compile_context>

<pallas_src>
import math

import jax
import jax.numpy as jnp
from jax.experimental import pallas as pl
from jax.experimental.pallas import tpu as pltpu

BN_EPS = 1e-5


def _round_up(n, m):
    return ((n + m - 1) // m) * m


def naive_relu_kernel(x_ref, w1_ref, w2_ref, b1_ref, b2_ref, w3_ref, b3_ref,
                      out_ref):
    """Transposed forward for one batch tile (batch lives on the lane axis).

    x_ref  : (feat, tile_b)   bf16   lane-dense input tile
    w1_ref : (emb_p, feat)    bf16   BN1-folded fc1, transposed, zero-padded
    w2_ref : (hid_p, emb_p)   bf16   BN2-folded fc2, transposed, zero-padded
    b1_ref : (emb_p, 1)       f32    BN1-folded fc1 bias (column)
    b2_ref : (hid_p, 1)       f32    BN2-folded fc2 bias (column)
    w3_ref : (hid_p, 1)       f32    fc3 weight (column)
    b3_ref : (1, 1)           f32    fc3 bias
    out_ref: (1, tile_b)      f32    lane-dense output row
    """
    x = x_ref[...]                                            # (feat, tb) bf16

    # fc1 (+BN1 folded) -> ReLU.  bf16 MXU operands, f32 accumulation.
    h = jnp.dot(w1_ref[...], x, preferred_element_type=jnp.float32)
    h = jnp.maximum(h + b1_ref[...], 0.0)                     # (emb_p, tb) f32

    # fc2 (+BN2 folded) -> ReLU.
    h = jnp.dot(w2_ref[...], h.astype(jnp.bfloat16),
                preferred_element_type=jnp.float32)
    h = jnp.maximum(h + b2_ref[...], 0.0)                     # (hid_p, tb) f32

    # fc3 (output_size == 1): VPU multiply + XLU sublane reduce, then bias.
    out = jnp.sum(h * w3_ref[...], axis=0, keepdims=True) + b3_ref[...]

    # final ReLU (NaiveModel_relu wrapper)
    out_ref[...] = jnp.maximum(out, 0.0)                      # (1, tb) f32


def init_params(key, input_size, embedding_size=100, hidden_size=20,
                output_size=1):
    """Mirror NaiveModel.__init__: Kaiming-normal (fan_in) weights, zero biases.

    Weights are stored as (in_features, out_features), so y = x @ W + b matches
    PyTorch's y = x @ weight.T + bias.
    """
    assert output_size == 1, "fc3 reduce path assumes output_size == 1"

    def kaiming(k, fan_in, fan_out):
        std = math.sqrt(2.0 / fan_in)
        return jax.random.normal(k, (fan_in, fan_out), jnp.float32) * std

    k1, k2, k3 = jax.random.split(key, 3)
    return dict(
        w1=kaiming(k1, input_size, embedding_size),
        b1=jnp.zeros((embedding_size,), jnp.float32),
        w2=kaiming(k2, embedding_size, hidden_size),
        b2=jnp.zeros((hidden_size,), jnp.float32),
        w3=kaiming(k3, hidden_size, output_size),
        b3=jnp.zeros((output_size,), jnp.float32),
    )


def pack_params(params, bn_eps=BN_EPS):
    """Fold eval-mode BN into fc1/fc2, transpose for the lane-dense kernel,
    zero-pad feature dims, and pre-cast matmul weights to bf16."""
    w1, b1 = params["w1"], params["b1"]      # (in, emb), (emb,)
    w2, b2 = params["w2"], params["b2"]      # (emb, hid), (hid,)
    w3, b3 = params["w3"], params["b3"]      # (hid, 1),  (1,)
    input_size, emb = w1.shape
    hid = w2.shape[1]
    assert w3.shape[1] == 1, "fc3 reduce path assumes output_size == 1"

    s = 1.0 / math.sqrt(1.0 + bn_eps)        # fresh-stats eval-mode BN scale
    emb_p = _round_up(emb, 128)              # MXU-friendly M (fc1) / K (fc2)
    hid_p = _round_up(hid, 8)

    w1t = jnp.zeros((emb_p, input_size), jnp.float32)
    w1t = w1t.at[:emb, :].set((w1 * s).T)
    w2t = jnp.zeros((hid_p, emb_p), jnp.float32)
    w2t = w2t.at[:hid, :emb].set((w2 * s).T)

    b1c = jnp.zeros((emb_p, 1), jnp.float32).at[:emb, 0].set(b1 * s)
    b2c = jnp.zeros((hid_p, 1), jnp.float32).at[:hid, 0].set(b2 * s)
    w3c = jnp.zeros((hid_p, 1), jnp.float32).at[:hid, 0].set(w3[:, 0])
    b3c = b3.reshape(1, 1).astype(jnp.float32)

    return (w1t.astype(jnp.bfloat16), w2t.astype(jnp.bfloat16),
            b1c, b2c, w3c, b3c)


def naive_model_relu_forward(x, packed, *, tile_b=2048):
    """x: (batch, input_size) f32 -> (batch, 1) f32."""
    w1t, w2t, b1c, b2c, w3c, b3c = packed
    batch, feat = x.shape
    assert w1t.shape[1] == feat, "packed weights do not match input feature dim"
    assert tile_b % 128 == 0

    # Lane-dense bf16 input slab (features on sublanes, batch on lanes).
    xt = x.astype(jnp.bfloat16).T                               # (feat, batch)

    # tile_b must be a multiple of 128 OR equal to the full batch dim.
    tb = batch if batch <= tile_b else tile_b
    num_tiles = pl.cdiv(batch, tb)          # ragged last block is masked

    param_specs = [pl.BlockSpec(p.shape, lambda i: (0, 0))      # VMEM-resident
                   for p in (w1t, w2t, b1c, b2c, w3c, b3c)]

    out = pl.pallas_call(
        naive_relu_kernel,
        out_shape=jax.ShapeDtypeStruct((1, batch), jnp.float32),
        grid=(num_tiles,),
        in_specs=[pl.BlockSpec((feat, tb), lambda i: (0, i))] + param_specs,
        out_specs=pl.BlockSpec((1, tb), lambda i: (0, i)),      # lane-dense out
        compiler_params=pltpu.CompilerParams(
            dimension_semantics=("parallel",)),
    )(xt, w1t, w2t, b1c, b2c, w3c, b3c)

    return out.reshape(batch, 1)


def reference_forward(x, params, bn_eps=BN_EPS):
    """Pure-JAX f32 reference of NaiveModel_relu in eval mode."""
    s = 1.0 / math.sqrt(1.0 + bn_eps)
    h = jnp.maximum((x @ params["w1"] + params["b1"]) * s, 0.0)
    h = jnp.maximum((h @ params["w2"] + params["b2"]) * s, 0.0)
    return jnp.maximum(h @ params["w3"] + params["b3"], 0.0)


if __name__ == "__main__":
    key = jax.random.PRNGKey(0)
    kx, kp, kx2 = jax.random.split(key, 3)

    input_size = 16          # spin-chain input features
    params = init_params(kp, input_size)
    packed = pack_params(params)

    # Case 1: small single-tile batch.
    batch = 8
    x = jax.random.normal(kx, (batch, input_size), jnp.float32)
    out = jax.block_until_ready(naive_model_relu_forward(x, packed))
    ref = reference_forward(x, params)
    assert out.shape == (batch, 1)
    assert bool(jnp.all(jnp.isfinite(out)))
    assert bool(jnp.all(out >= 0.0))
    # bf16 MXU operands with f32 accumulation -> allow small differences.
    assert bool(jnp.allclose(out, ref, rtol=5e-2, atol=5e-2))

    # Case 2: multi-tile grid with a ragged (masked) last block.
    batch2 = 300
    x2 = jax.random.normal(kx2, (batch2, input_size), jnp.float32)
    out2 = jax.block_until_ready(
        naive_model_relu_forward(x2, packed, tile_b=128))
    ref2 = reference_forward(x2, params)
    assert out2.shape == (batch2, 1)
    assert bool(jnp.all(jnp.isfinite(out2)))
    assert bool(jnp.all(out2 >= 0.0))
    assert bool(jnp.allclose(out2, ref2, rtol=5e-2, atol=5e-2))

    print("KERNEL_OK")
</pallas_src>

<mosaic_0001>
module attributes {stable_mosaic.version = 11 : i64} {
  func.func @naive_relu_kernel(%arg0: i32, %arg1: memref<16x8xbf16, #tpu.memory_space<vmem>>, %arg2: memref<128x16xbf16, #tpu.memory_space<vmem>>, %arg3: memref<24x128xbf16, #tpu.memory_space<vmem>>, %arg4: memref<128x1xf32, #tpu.memory_space<vmem>>, %arg5: memref<24x1xf32, #tpu.memory_space<vmem>>, %arg6: memref<24x1xf32, #tpu.memory_space<vmem>>, %arg7: memref<1x1xf32, #tpu.memory_space<vmem>>, %arg8: memref<1x8xf32, #tpu.memory_space<vmem>>) attributes {dimension_semantics = [#tpu.dimension_semantics<parallel>], iteration_bounds = array<i64: 1>, scalar_prefetch = 0 : i64, scratch_operands = 0 : i64, tpu.core_type = #tpu.core_type<tc>, window_params = [{transform_indices = @transform_0, window_bounds = array<i64: 16, 8>}, {pipeline_mode = #tpu.pipeline_mode<synchronous>, transform_indices = @transform_1, window_bounds = array<i64: 128, 16>}, {pipeline_mode = #tpu.pipeline_mode<synchronous>, transform_indices = @transform_2, window_bounds = array<i64: 24, 128>}, {pipeline_mode = #tpu.pipeline_mode<synchronous>, transform_indices = @transform_3, window_bounds = array<i64: 128, 1>}, {pipeline_mode = #tpu.pipeline_mode<synchronous>, transform_indices = @transform_4, window_bounds = array<i64: 24, 1>}, {pipeline_mode = #tpu.pipeline_mode<synchronous>, transform_indices = @transform_5, window_bounds = array<i64: 24, 1>}, {pipeline_mode = #tpu.pipeline_mode<synchronous>, transform_indices = @transform_6, window_bounds = array<i64: 1, 1>}, {transform_indices = @transform_7, window_bounds = array<i64: 1, 8>}]} {
    %c0 = arith.constant 0 : index
    %c0_0 = arith.constant 0 : index
    %0 = vector.load %arg1[%c0, %c0_0] : memref<16x8xbf16, #tpu.memory_space<vmem>>, vector<16x8xbf16>
    %c0_1 = arith.constant 0 : index
    %c0_2 = arith.constant 0 : index
    %1 = vector.load %arg2[%c0_1, %c0_2] : memref<128x16xbf16, #tpu.memory_space<vmem>>, vector<128x16xbf16>
    %cst = arith.constant dense<0.000000e+00> : vector<128x8xf32>
    %2 = tpu.matmul %1, %0, %cst {dimension_numbers = #tpu.dot_dimension_numbers<[1], [0], [0], [1], [0, 0, 1, 1], [], []>} : vector<128x16xbf16>, vector<16x8xbf16>, vector<128x8xf32> -> vector<128x8xf32>
    %c0_3 = arith.constant 0 : index
    %c0_4 = arith.constant 0 : index
    %3 = vector.load %arg4[%c0_3, %c0_4] : memref<128x1xf32, #tpu.memory_space<vmem>>, vector<128x1xf32>
    %4 = vector.broadcast %3 : vector<128x1xf32> to vector<128x8xf32>
    %5 = arith.addf %2, %4 : vector<128x8xf32>
    %cst_5 = arith.constant 0.000000e+00 : f32
    %6 = vector.broadcast %cst_5 : f32 to vector<128x8xf32>
    %7 = arith.maximumf %5, %6 : vector<128x8xf32>
    %c0_6 = arith.constant 0 : index
    %c0_7 = arith.constant 0 : index
    %8 = vector.load %arg3[%c0_6, %c0_7] : memref<24x128xbf16, #tpu.memory_space<vmem>>, vector<24x128xbf16>
    %9 = arith.truncf %7 : vector<128x8xf32> to vector<128x8xbf16>
    %cst_8 = arith.constant dense<0.000000e+00> : vector<24x8xf32>
    %10 = tpu.matmul %8, %9, %cst_8 {dimension_numbers = #tpu.dot_dimension_numbers<[1], [0], [0], [1], [0, 0, 1, 1], [], []>} : vector<24x128xbf16>, vector<128x8xbf16>, vector<24x8xf32> -> vector<24x8xf32>
    %c0_9 = arith.constant 0 : index
    %c0_10 = arith.constant 0 : index
    %11 = vector.load %arg5[%c0_9, %c0_10] : memref<24x1xf32, #tpu.memory_space<vmem>>, vector<24x1xf32>
    %12 = vector.broadcast %11 : vector<24x1xf32> to vector<24x8xf32>
    %13 = arith.addf %10, %12 : vector<24x8xf32>
    %cst_11 = arith.constant 0.000000e+00 : f32
    %14 = vector.broadcast %cst_11 : f32 to vector<24x8xf32>
    %15 = arith.maximumf %13, %14 : vector<24x8xf32>
    %c0_12 = arith.constant 0 : index
    %c0_13 = arith.constant 0 : index
    %16 = vector.load %arg6[%c0_12, %c0_13] : memref<24x1xf32, #tpu.memory_space<vmem>>, vector<24x1xf32>
    %17 = vector.broadcast %16 : vector<24x1xf32> to vector<24x8xf32>
    %18 = arith.mulf %15, %17 : vector<24x8xf32>
    %cst_14 = arith.constant dense<0.000000e+00> : vector<8xf32>
    %19 = vector.multi_reduction <add>, %18, %cst_14 [0] : vector<24x8xf32> to vector<8xf32>
    %20 = vector.shape_cast %19 : vector<8xf32> to vector<1x8xf32>
    %c0_15 = arith.constant 0 : index
    %c0_16 = arith.constant 0 : index
    %21 = vector.load %arg7[%c0_15, %c0_16] : memref<1x1xf32, #tpu.memory_space<vmem>>, vector<1x1xf32>
    %22 = vector.broadcast %21 : vector<1x1xf32> to vector<1x8xf32>
    %23 = arith.addf %20, %22 : vector<1x8xf32>
    %cst_17 = arith.constant 0.000000e+00 : f32
    %24 = vector.broadcast %cst_17 : f32 to vector<1x8xf32>
    %25 = arith.maximumf %23, %24 : vector<1x8xf32>
    %c0_18 = arith.constant 0 : index
    %c0_19 = arith.constant 0 : index
    %26 = vector.load %arg8[%c0_18, %c0_19] : memref<1x8xf32, #tpu.memory_space<vmem>>, vector<1x8xf32>
    tpu.vector_store %arg8[%c0_18, %c0_19], %25 {strides = array<i32>} : memref<1x8xf32, #tpu.memory_space<vmem>>, vector<1x8xf32>,
    return
  }
  func.func @transform_0(%arg0: i32) -> (i32, i32) {
    %c0_i32 = arith.constant 0 : i32
    %c0_i32_0 = arith.constant 0 : i32
    return %c0_i32, %arg0 : i32, i32
  }
  func.func @transform_1(%arg0: i32) -> (i32, i32) {
    %c0_i32 = arith.constant 0 : i32
    %c0_i32_0 = arith.constant 0 : i32
    %c0_i32_1 = arith.constant 0 : i32
    return %c0_i32, %c0_i32_0 : i32, i32
  }
  func.func @transform_2(%arg0: i32) -> (i32, i32) {
    %c0_i32 = arith.constant 0 : i32
    %c0_i32_0 = arith.constant 0 : i32
    %c0_i32_1 = arith.constant 0 : i32
    return %c0_i32, %c0_i32_0 : i32, i32
  }
  func.func @transform_3(%arg0: i32) -> (i32, i32) {
    %c0_i32 = arith.constant 0 : i32
    %c0_i32_0 = arith.constant 0 : i32
    %c0_i32_1 = arith.constant 0 : i32
    return %c0_i32, %c0_i32_0 : i32, i32
  }
  func.func @transform_4(%arg0: i32) -> (i32, i32) {
    %c0_i32 = arith.constant 0 : i32
    %c0_i32_0 = arith.constant 0 : i32
    %c0_i32_1 = arith.constant 0 : i32
    return %c0_i32, %c0_i32_0 : i32, i32
  }
  func.func @transform_5(%arg0: i32) -> (i32, i32) {
    %c0_i32 = arith.constant 0 : i32
    %c0_i32_0 = arith.constant 0 : i32
    %c0_i32_1 = arith.constant 0 : i32
    return %c0_i32, %c0_i32_0 : i32, i32
  }
  func.func @transform_6(%arg0: i32) -> (i32, i32) {
    %c0_i32 = arith.constant 0 : i32
    %c0_i32_0 = arith.constant 0 : i32
    %c0_i32_1 = arith.constant 0 : i32
    return %c0_i32, %c0_i32_0 : i32, i32
  }
  func.func @transform_7(%arg0: i32) -> (i32, i32) {
    %c0_i32 = arith.constant 0 : i32
    %c0_i32_0 = arith.constant 0 : i32
    return %c0_i32, %arg0 : i32, i32
  }
}

</mosaic_0001>

<bundles_post_ra>
// kernel: tpu_custom_call.1
= control target key start
LH: loop header
LB: loop body
LE: loop exit
PB: predicated region body
PF: predicated region fallthrough
CT: control target
= control target key end

     0   :  { %s758_s0 = inlined_call_operand.vmem [shape: bf16[16,8], index: 0, kind: input, shape index: {}]   ;;  %s759_s1 = inlined_call_operand.vmem [shape: bf16[128,16], index: 1, kind: input, shape index: {}]   ;;  %s760_s2 = inlined_call_operand.vmem [shape: bf16[24,128], index: 2, kind: input, shape index: {}]   ;;  %s761_s3 = inlined_call_operand.vmem [shape: f32[128,1], index: 3, kind: input, shape index: {}]   ;;  %s762_s4 = inlined_call_operand.vmem [shape: f32[24,1], index: 4, kind: input, shape index: {}]   ;;  %s763_s5 = inlined_call_operand.vmem [shape: f32[24,1], index: 5, kind: input, shape index: {}]   ;;  %s764_s6 = inlined_call_operand.<no memory space> [shape: f32[1,1], index: 6, kind: input, shape index: {}]   ;;  %s765_s7 = inlined_call_operand.hbm [shape: f32[1,8], index: 7, kind: output, shape index: {}]  }
   0x1   :  { %v12_v0 = vstv %s764_s6 }
   0x2   :  { %13 = vst [vmem:[#allocation2] sm:$0x1] %v12_v0 }
   0x3   :  { %v559_v1 = vld [vmem:[%s758_s0] sm:$0xff]   ;;  %vm190_vm0 = vcmask 130048   ;;  %v561_v3 = vld [vmem:[%s759_s1 + $0x8] sm:$0xff]   ;;  %v594_v4 = vmov 0   ;;  %v562_v5 = vld [vmem:[%s759_s1 + $0x10] sm:$0xff]  }
   0x4   :  { %v560_v2 = vld [vmem:[%s759_s1] sm:$0xff]   ;;  %517 = vmatprep.subr.bf16.mxu0 %v559_v1  ;;  %557 = vset.pattern.permute.xlu0 %v594_v4  ;;  %v50_v7 = vld [vmem:[%s761_s3 + $0x10] sm:$0xff]  ;;  %v563_v8 = vld [vmem:[%s759_s1 + $0x18] sm:$0xff]  }
   0x5   :  { %518 = vmatpush3.bf16.msra.mxu0 %v559_v1  ;;  %519 = vmatprep.mubr.msk.bf16.mxu0 %vm190_vm0, %v560_v2  ;;  %v48_v6 = vld [vmem:[%s761_s3] sm:$0xff]  ;;  %v49_v10 = vld [vmem:[%s761_s3 + $0x8] sm:$0xff]  ;;  %v51_v11 = vld [vmem:[%s761_s3 + $0x18] sm:$0xff] }
   0x6   :  { %558 = vset.pattern.permute.xlu1 %v594_v4  ;;  %66 = vperm.xlu0 %557, %v48_v6   ;;  %v564_v9 = vld [vmem:[%s759_s1 + $0x20] sm:$0xff]   ;;  %v53_v13 = vld [vmem:[%s761_s3 + $0x28] sm:$0xff] }
   0x7   :  { %76 = vperm.xlu1 %558, %v50_v7   ;;  %v52_v12 = vld [vmem:[%s761_s3 + $0x20] sm:$0xff] }
   0x8   :  { %520 = vmatmul.mubr.msk.bf16.vlgmr.msra.gmra.mrb[0].mxu0 %vm190_vm0, %v561_v3 }
   0x9   :  { %523 = vmatprep.mubr.msk.bf16.mxu0 %vm190_vm0, %v562_v5 }
   0xa   :  { %71 = vperm.xlu0 %557, %v49_v10  }
   0xb   :  { %81 = vperm.xlu1 %558, %v51_v11  }
  0x10   :  { %524 = vmatmul.mubr.msk.bf16.gmra.mrb[4].mxu0 %vm190_vm0, %v563_v8 }
  0x11   :  { %527 = vmatprep.mubr.msk.bf16.mxu0 %vm190_vm0, %v564_v9 }
  0x12   :  { %14 = vsyncpa [#allocation4], 0  ;;  %v565_v14 = vld [vmem:[%s759_s1 + $0x28] sm:$0xff]   ;;  %86 = vperm.xlu0 %557, %v52_v12   ;;  %v566_v15 = vld [vmem:[%s759_s1 + $0x30] sm:$0xff]   ;;  %91 = vperm.xlu1 %558, %v53_v13   ;;  %vm439_vm1 = vcmask 64512   ;;  %vm463_vm2 = vcmask 57344  }
  0x13   :  { %v54_v16 = vld [vmem:[%s761_s3 + $0x30] sm:$0xff]  ;;  %v55_v17 = vld [vmem:[%s761_s3 + $0x38] sm:$0xff]  ;;  %v56_v18 = vld [vmem:[%s761_s3 + $0x40] sm:$0xff] }
  0x14   :  { %v57_v19 = vld [vmem:[%s761_s3 + $0x48] sm:$0xff]  ;;  %v567_v20 = vld [vmem:[%s759_s1 + $0x38] sm:$0xff]   ;;  %v58_v21 = vld [vmem:[%s761_s3 + $0x50] sm:$0xff] }
  0x15   :  { %v59_v22 = vld [vmem:[%s761_s3 + $0x58] sm:$0xff]  ;;  %v60_v23 = vld [vmem:[%s761_s3 + $0x60] sm:$0xff]  ;;  %v61_v24 = vld [vmem:[%s761_s3 + $0x68] sm:$0xff] }
  0x16   :  { %96 = vperm.xlu0 %557, %v54_v16   ;;  %101 = vperm.xlu1 %558, %v55_v17   ;;  %v62_v25 = vld [vmem:[%s761_s3 + $0x70] sm:$0xff]  ;;  %v63_v26 = vld [vmem:[%s761_s3 + $0x78] sm:$0xff]  ;;  %v339_v27 = vld [vmem:[%s762_s4] sm:$0xff] }
  0x17   :  { %v340_v28 = vld [vmem:[%s762_s4 + $0x8] sm:$0xff]  ;;  %v341_v29 = vld [vmem:[%s762_s4 + $0x10] sm:$0xff]  ;;  %v418_v30 = vld [vmem:[%s763_s5] sm:$0xff] }
  0x18   :  { %528 = vmatmul.mubr.msk.bf16.gmra.mrb[8].mxu0 %vm190_vm0, %v565_v14  ;;  %v419_v31 = vld [vmem:[%s763_s5 + $0x8] sm:$0xff]  ;;  %v420_v32 = vld [vmem:[%s763_s5 + $0x10] sm:$0xff]  ;;  %v451_v33 = vld [vmem:[#allocation2] sm:$0x1] }
  0x19   :  { %531 = vmatprep.mubr.msk.bf16.mxu0 %vm190_vm0, %v566_v15  ;;  %v568_v34 = vld [vmem:[%s760_s2] sm:$0xff]  }
  0x1a   :  { %106 = vperm.xlu0 %557, %v56_v18   ;;  %111 = vperm.xlu1 %558, %v57_v19  }
  0x1b   :  { %551 = vmatprep.mubr.bf16.mxu1 %v568_v34 }
  0x1e   :  { %116 = vperm.xlu0 %557, %v58_v21   ;;  %121 = vperm.xlu1 %558, %v59_v22  }
  0x20   :  { %532 = vmatmul.mubr.msk.bf16.gmra.mrb[12].mxu0 %vm190_vm0, %v567_v20 }
  0x22   :  { %126 = vperm.xlu0 %557, %v60_v23   ;;  %131 = vperm.xlu1 %558, %v61_v24  }
  0x26   :  { %136 = vperm.xlu0 %557, %v62_v25   ;;  %141 = vperm.xlu1 %558, %v63_v26  }
  0x2a   :  { %344 = vperm.xlu0 %557, %v339_v27   ;;  %349 = vperm.xlu1 %558, %v340_v28  }
  0x2e   :  { %354 = vperm.xlu0 %557, %v341_v29   ;;  %423 = vperm.xlu1 %558, %v418_v30  }
  0x32   :  { %428 = vperm.xlu0 %557, %v419_v31   ;;  %433 = vperm.xlu1 %558, %v420_v32  }
  0x36   :  { %454 = vperm.xlu0 %557, %v451_v33  }
  0x85   :  { %v67_v35 = vpop.permute.xlu0 %66 }
  0x86   :  { %v77_v36 = vpop.permute.xlu1 %76 }
  0x89   :  { %v72_v37 = vpop.permute.xlu0 %71 }
  0x8a   :  { %v82_v38 = vpop.permute.xlu1 %81 }
  0x91   :  { %v87_v39 = vpop.permute.xlu0 %86  ;;  %v92_v40 = vpop.permute.xlu1 %91 }
  0x95   :  { %v97_v41 = vpop.permute.xlu0 %96  ;;  %v102_v45 = vpop.permute.xlu1 %101 }
  0x99   :  { %v107_v53 = vpop.permute.xlu0 %106  ;;  %v112_v57 = vpop.permute.xlu1 %111 }
  0x9d   :  { %v117_v2 = vpop.permute.xlu0 %116  ;;  %v122_v6 = vpop.permute.xlu1 %121 }
  0xa1   :  { %v127_v14 = vpop.permute.xlu0 %126  ;;  %v132_v19 = vpop.permute.xlu1 %131 }
  0xa5   :  { %v137_v26 = vpop.permute.xlu0 %136  ;;  %v142_v31 = vpop.permute.xlu1 %141 }
  0xdb   :  { %v521_v42 = vpop.f32.mrb[0].mxu0 }
  0xdc   :  { %v258_v43 = vadd.f32 %v521_v42, %v77_v36  ;;  %v249_v44 = vpop.f32.mrb[1].mxu0 }
  0xdd   :  { %v250_v46 = vadd.f32 %v249_v44, %v67_v35  ;;  %v522_v47 = vpop.f32.mrb[2].mxu0  ;;  %v345_v44 = vpop.permute.xlu0 %344 }
  0xde   :  { %v261_v48 = vadd.f32 %v522_v47, %v82_v38  ;;  %v252_v49 = vpop.f32.mrb[3].mxu0  ;;  %v314_v51 = vmax.f32 %v258_v43, 0.0  ;;  %v569_v43 = vld [vmem:[%s760_s2 + $0x8] ss:$0 sps:$4 sm:$0xff]   ;;  %s595_s2 = smov [#allocation3]  }
  0xdf   :  { %v253_v50 = vadd.f32 %v252_v49, %v72_v37  ;;  %v312_v54 = vmax.f32 %v250_v46, 0.0  ;;  %s471_s13 = sshll.u32 %s595_s2, 4  ;;  %s472_s13 = int_to_ptr.vmem [resolvable:$true] %s471_s13 }
  0xe0   :  { %v315_v52 = vmax.f32 %v261_v48, 0.0  ;;  %s570_s14 = scalar_lea.vmem %s472_s13, 16  ;;  %s574_s15 = scalar_lea.vmem %s472_s13, 32 }
  0xe1   :  { %v313_v55 = vmax.f32 %v253_v50, 0.0  ;;  %v355_v46 = vpop.permute.xlu0 %354  ;;  %p571_p0 = scmp.ne.s32.totalorder %s472_s13, %s570_s14  ;;  %p575_p1 = scmp.lt.s32.totalorder %s472_s13, %s472_s13 }
  0xe2   :  { %v332_v56 = vpack.c.bf16 %v315_v52, %v314_v51  ;;  %p576_p2 = scmp.lt.s32.totalorder %s574_s15, %s570_s14 }
  0xe3   :  { %v525_v58 = vpop.f32.mrb[4].mxu0  ;;  %v331_v59 = vpack.c.bf16 %v313_v55, %v312_v54 }
  0xe4   :  { %v274_v60 = vadd.f32 %v525_v58, %v97_v41  ;;  %v265_v61 = vpop.f32.mrb[5].mxu0  ;;  %p577_p3 = por %p576_p2, %p575_p1 }
  0xe5   :  { %v266_v62 = vadd.f32 %v265_v61, %v87_v39  ;;  %v526_v63 = vpop.f32.mrb[6].mxu0  ;;  %535 = vmatprep.subr.bf16.mxu1 %v331_v59 }
  0xe6   :  { %v277_v0 = vadd.f32 %v526_v63, %v102_v45  ;;  %v268_v1 = vpop.f32.mrb[7].mxu0  ;;  %536 = vmatpush3.bf16.msra.mxu1 %v331_v59  ;;  %v318_v4 = vmax.f32 %v274_v60, 0.0  ;;  %v350_v45 = vpop.permute.xlu1 %349  ;;  %p578_p4 = pnand %p577_p3, %p571_p0 }
  0xe7   :  { %v269_v3 = vadd.f32 %v268_v1, %v92_v40  ;;  %537 = vmatprep.subr.bf16.mxu1 %v332_v56  ;;  %v316_v7 = vmax.f32 %v266_v62, 0.0  ;;  %v429_v59 = vpop.permute.xlu0 %428 }
  0xe8   :  { %v319_v5 = vmax.f32 %v277_v0, 0.0 }
  0xe9   :  { %v317_v8 = vmax.f32 %v269_v3, 0.0  ;;  %v457_v3 = vlaneseq }
  0xea   :  { %v334_v9 = vpack.c.bf16 %v319_v5, %v318_v4  ;;  %538 = vmatpush3.bf16.msra.mxu1 %v332_v56  ;;  %v424_v48 = vpop.permute.xlu1 %423 }
  0xeb   :  { %v333_v10 = vpack.c.bf16 %v317_v8, %v316_v7  ;;  %v529_v11 = vpop.f32.mrb[8].mxu0 }
  0xec   :  { %v290_v12 = vadd.f32 %v529_v11, %v117_v2  ;;  %v281_v13 = vpop.f32.mrb[9].mxu0  ;;  %v455_v11 = vpop.permute.xlu0 %454 }
  0xed   :  { %v282_v15 = vadd.f32 %v281_v13, %v107_v53  ;;  %v530_v16 = vpop.f32.mrb[10].mxu0  ;;  %539 = vmatprep.subr.bf16.mxu1 %v333_v10 }
  0xee   :  { %v293_v17 = vadd.f32 %v530_v16, %v122_v6  ;;  %v284_v18 = vpop.f32.mrb[11].mxu0  ;;  %540 = vmatpush3.bf16.msra.mxu1 %v333_v10  ;;  %v322_v21 = vmax.f32 %v290_v12, 0.0  ;;  %v434_v60 = vpop.permute.xlu1 %433  ;;  %v458_v6 = vshrl.u32 %v457_v3, 7 }
  0xef   :  { %v285_v20 = vadd.f32 %v284_v18, %v112_v57  ;;  %541 = vmatprep.subr.bf16.mxu1 %v334_v9  ;;  %v320_v23 = vmax.f32 %v282_v15, 0.0 }
  0xf0   :  { %v323_v22 = vmax.f32 %v293_v17, 0.0 }
  0xf1   :  { %v321_v24 = vmax.f32 %v285_v20, 0.0 }
  0xf2   :  { %v336_v25 = vpack.c.bf16 %v323_v22, %v322_v21  ;;  %542 = vmatpush3.bf16.msra.mxu1 %v334_v9  ;;  %v459_v9 = vsub.s32 0, %v458_v6 }
  0xf3   :  { %v335_v27 = vpack.c.bf16 %v321_v24, %v320_v23  ;;  %v533_v28 = vpop.f32.mrb[12].mxu0 }
  0xf4   :  { %v306_v29 = vadd.f32 %v533_v28, %v137_v26  ;;  %v297_v30 = vpop.f32.mrb[13].mxu0  ;;  %v460_v13 = vrot.slane %v455_v11, %v459_v9 }
  0xf5   :  { %v298_v32 = vadd.f32 %v297_v30, %v127_v14  ;;  %v534_v33 = vpop.f32.mrb[14].mxu0  ;;  %543 = vmatprep.subr.bf16.mxu1 %v335_v27 }
  0xf6   :  { %v309_v34 = vadd.f32 %v534_v33, %v142_v31  ;;  %v300_v35 = vpop.f32.mrb[15].mxu0  ;;  %544 = vmatpush3.bf16.msra.mxu1 %v335_v27  ;;  %v326_v37 = vmax.f32 %v306_v29, 0.0 }
  0xf7   :  { %v301_v36 = vadd.f32 %v300_v35, %v132_v19  ;;  %545 = vmatprep.subr.bf16.mxu1 %v336_v25  ;;  %v324_v39 = vmax.f32 %v298_v32, 0.0 }
  0xf8   :  { %v327_v38 = vmax.f32 %v309_v34, 0.0 }
  0xf9   :  { %v325_v40 = vmax.f32 %v301_v36, 0.0 }
  0xfa   :  { %v338_v41 = vpack.c.bf16 %v327_v38, %v326_v37  ;;  %546 = vmatpush3.bf16.msra.mxu1 %v336_v25 }
  0xfb   :  { %v337_v42 = vpack.c.bf16 %v325_v40, %v324_v39 }
  0xfd   :  { %547 = vmatprep.subr.bf16.mxu1 %v337_v42 }
  0xfe   :  { %548 = vmatpush3.bf16.msra.mxu1 %v337_v42 }
  0xff   :  { %549 = vmatprep.subr.bf16.mxu1 %v338_v41 }
 0x102   :  { %550 = vmatpush3.bf16.msra.mxu1 %v338_v41 }
 0x105   :  { %552 = vmatmul.mubr.bf16.vlgmr.msra.gmra.mrb[0].mxu1 %v569_v43 }
 0x1d8   :  { %v553_v47 = vpop.f32.mrb[0].mxu1 }
 0x1d9   :  { %v410_v49 = vadd.f32 %v553_v47, %v355_v46  ;;  %v401_v50 = vpop.f32.mrb[1].mxu1 }
 0x1da   :  { %v402_v51 = vadd.f32 %v401_v50, %v345_v44  ;;  %v554_v52 = vpop.f32.mrb[2].mxu1 }
 0x1db   :  { %v404_v53 = vpop.f32.mrb[3].mxu1  ;;  %v417_v54 = vmax.f32 %v410_v49, 0.0 }
 0x1dc   :  { %v415_v55 = vmax.f32 %v402_v51, 0.0  ;;  %v405_v56 = vadd.f32 %v404_v53, %v350_v45 }
 0x1dd   :  { %v438_v61 = vmul.f32 %v434_v60, %v417_v54 }
 0x1de   :  { %v436_v57 = vmul.f32 %v424_v48, %v415_v55  ;;  %v416_v58 = vmax.f32 %v405_v56, 0.0 }
 0x1df   :  { %v443_v2 = vsel %vm439_vm1, %v438_v61, 0.0 }
 0x1e0   :  { %v437_v62 = vmul.f32 %v429_v59, %v416_v58  ;;  %v440_v63 = vsel %vm439_vm1, %v436_v57, 0.0 }
 0x1e2   :  { %v441_v0 = vsel %vm439_vm1, %v437_v62, 0.0 }
 0x1e3   :  { %v442_v1 = vadd.f32 %v441_v0, %v440_v63 }
 0x1e5   :  { %v444_v4 = vadd.f32 %v443_v2, %v442_v1 }
 0x1e7   :  { %v445_v5 = vrot.slane %v444_v4, 4 }
 0x1e9   :  { %v446_v7 = vadd.f32 %v445_v5, %v444_v4 }
 0x1eb   :  { %v447_v8 = vrot.slane %v446_v7, 2 }
 0x1ed   :  { %v448_v10 = vadd.f32 %v447_v8, %v446_v7 }
 0x1ef   :  { %v449_v12 = vrot.slane %v448_v10, 1 }
 0x1f1   :  { %v450_v14 = vadd.f32 %v449_v12, %v448_v10 }
 0x1f3   :  { %v461_v15 = vadd.f32 %v460_v13, %v450_v14 }
 0x1f5   :  { %v462_v16 = vmax.f32 %v461_v15, 0.0 }
 0x1f7   :  { %464 = vst.msk [vmem:[#allocation3] sm:$0x1] %vm463_vm2, %v462_v16 }
 0x1f8   :  { %581 = shalt.err (!%p578_p4)
}
 0x1f9   :  { %s582_s18 = scalar_lea.hbm %s765_s7, 16 }
 0x1fa   :  { %p583_p5 = scmp.ne.s32.totalorder %s765_s7, %s582_s18  ;;  %p586_p6 = scmp.lt.u32.totalorder %s582_s18, %s765_s7 }
 0x1fc   :  { %p588_p7 = pnand %p586_p6, %p583_p5 }
 0x1fe   :  { %591 = shalt.err (!%p588_p7)
}
 0x1ff   :  { %474 = dma.vmem_to_hbm [thread:$0]  %s472_s13, 16, %s765_s7, [#allocation4]  }
 0x200   :  { %592 = dma.done.wait [#allocation4], 16  }
 0x201   :  { %593 = vsyncadd [#allocation4], 4294967280 }
 0x202   :  { %478 = vsyncpa [#allocation4], 1 }

</bundles_post_ra>
